<compile_context>
chip_gen: v5e
topology: v5e:2x2
jax: 0.10.0
libtpu: 0.0.40
codegen_flags: <defaults>
</compile_context>

<pallas_src>
import functools

import jax
import jax.numpy as jnp
from jax import lax
from jax.experimental import pallas as pl
from jax.experimental.pallas import tpu as pltpu

LN_EPS = 1e-5  # PyTorch nn.LayerNorm default


def _round_up(n, m):
    return ((n + m - 1) // m) * m


def classmlp_kernel(x_ref, w1_ref, b1_ref, g_ref, beta_ref, w2_ref, b2_ref, o_ref,
                    *, cast_bf16):
    # ---- Linear 1 + ReLU (f32 accumulate on the MXU).
    x = x_ref[...]
    if cast_bf16:
        x = x.astype(jnp.bfloat16)  # in-kernel cast: HBM traffic stays in x's dtype
    h = jnp.dot(x, w1_ref[...], preferred_element_type=jnp.float32)
    h = jnp.maximum(h + b1_ref[...], 0.0)

    # ---- LayerNorm over num_hiddens (biased variance, eps=1e-5), affine.
    inv_h = 1.0 / h.shape[-1]                           # compile-time constant
    mean = jnp.sum(h, axis=-1, keepdims=True) * inv_h
    cent = h - mean
    var = jnp.sum(cent * cent, axis=-1, keepdims=True) * inv_h
    scale = lax.rsqrt(var + LN_EPS) * g_ref[...]        # fuse inv-std with gamma
    h = cent * scale + beta_ref[...]

    # ---- Linear 2 + ReLU (2-wide logits; compute is nowhere near the bottleneck).
    if cast_bf16:
        h = h.astype(jnp.bfloat16)
    logits = jnp.dot(h, w2_ref[...], preferred_element_type=jnp.float32) + b2_ref[...]
    logits = jnp.maximum(logits, 0.0)

    # ---- 2-class softmax in sigmoid form (exact, no cross-lane max/sum, no NaN path).
    l0 = logits[:, 0:1]
    l1 = logits[:, 1:2]
    p1 = 1.0 / (1.0 + jnp.exp(l0 - l1))   # == softmax([l0, l1])[1]
    p0 = 1.0 - p1

    lane = lax.broadcasted_iota(jnp.int32, logits.shape, 1)   # (tile_b, 2)
    o_ref[...] = jnp.where(lane == 0, p0, p1).astype(o_ref.dtype)


def prepare_params(params, mxu_dtype=None):
    """Per-parameter-set prep done once (hoisted out of the per-call hot path)."""
    w1, b1, gamma, beta, w2, b2 = params
    num_hiddens = w1.shape[1]
    w_dt = jnp.float32 if mxu_dtype is None else mxu_dtype
    return (
        w1.astype(w_dt),
        b1.reshape(1, num_hiddens).astype(jnp.float32),
        gamma.reshape(1, num_hiddens).astype(jnp.float32),
        beta.reshape(1, num_hiddens).astype(jnp.float32),
        w2.astype(w_dt),
        b2.reshape(1, 2).astype(jnp.float32),
    )


def _pick_tile(batch, requested=None, cap=8192):
    """Batch tile: multiple of 8 (f32 sublane), <= batch, large enough to amortize
    per-step overhead, and (by default) keeping >= 2 grid steps for v7x's 2 TCs."""
    if batch <= 64:
        return batch                                   # single full block (always legal)
    if requested is None:
        requested = min(cap, _round_up(pl.cdiv(batch, 2), 32))
    tile = min(_round_up(requested, 32), (batch // 8) * 8)
    return max(tile, 8)


def classmlp_forward(x, prepared, *, tile_b=None):
    """CLASSMLP forward. `prepared` comes from prepare_params (optionally bf16 weights)."""
    w1, b1, gamma, beta, w2, b2 = prepared
    B, num_inputs = x.shape
    num_hiddens = w1.shape[1]
    cast_bf16 = (w1.dtype == jnp.bfloat16)

    tile_b = _pick_tile(B, tile_b)
    grid = (pl.cdiv(B, tile_b),)   # ragged last block handled by Pallas (no jnp.pad)

    # VMEM budget: residents + double-buffered x/out tiles + ~2x f32 temps + 20% headroom.
    x_item = jnp.dtype(x.dtype).itemsize
    w_item = jnp.dtype(w1.dtype).itemsize
    weight_bytes = (num_inputs * num_hiddens * w_item
                    + 3 * num_hiddens * 4
                    + num_hiddens * 2 * w_item + 2 * 4)
    tile_bytes = 2 * tile_b * (num_inputs * x_item + 2 * 4)
    temp_bytes = 2 * tile_b * num_hiddens * 4
    vmem_limit = int(1.2 * (weight_bytes + tile_bytes + temp_bytes))
    vmem_limit = min(max(vmem_limit, 32 << 20), 48 << 20)   # stays under v7x's 64 MiB

    resident = lambda shape: pl.BlockSpec(shape, lambda i: (0, 0))  # VMEM-resident weights

    return pl.pallas_call(
        functools.partial(classmlp_kernel, cast_bf16=cast_bf16),
        out_shape=jax.ShapeDtypeStruct((B, 2), jnp.float32),
        grid=grid,
        in_specs=[
            pl.BlockSpec((tile_b, num_inputs), lambda i: (i, 0)),   # x: pipelined per tile
            resident((num_inputs, num_hiddens)),                    # W1
            resident((1, num_hiddens)),                             # b1
            resident((1, num_hiddens)),                             # gamma
            resident((1, num_hiddens)),                             # beta
            resident((num_hiddens, 2)),                             # W2
            resident((1, 2)),                                       # b2
        ],
        out_specs=pl.BlockSpec((tile_b, 2), lambda i: (i, 0)),      # lean 8 B/row writeback
        compiler_params=pltpu.CompilerParams(
            dimension_semantics=("parallel",),
            vmem_limit_bytes=vmem_limit,
        ),
    )(x, w1, b1, gamma, beta, w2, b2)


def init_params(key, num_inputs, num_hiddens):
    k1, k2, k3, k4 = jax.random.split(key, 4)
    bound1 = 1.0 / jnp.sqrt(num_inputs)
    bound2 = 1.0 / jnp.sqrt(num_hiddens)
    w1 = jax.random.uniform(k1, (num_inputs, num_hiddens), jnp.float32, -bound1, bound1)
    b1 = jax.random.uniform(k2, (num_hiddens,), jnp.float32, -bound1, bound1)
    gamma = jnp.ones((num_hiddens,), jnp.float32)   # LayerNorm weight init
    beta = jnp.zeros((num_hiddens,), jnp.float32)   # LayerNorm bias init
    w2 = jax.random.uniform(k3, (num_hiddens, 2), jnp.float32, -bound2, bound2)
    b2 = jax.random.uniform(k4, (2,), jnp.float32, -bound2, bound2)
    return (w1, b1, gamma, beta, w2, b2)


def reference_forward(x, params):
    # Pure-JAX reference matching PyTorch semantics.
    w1, b1, gamma, beta, w2, b2 = params
    h = jnp.maximum(x @ w1 + b1, 0.0)
    mean = jnp.mean(h, axis=-1, keepdims=True)
    var = jnp.mean((h - mean) ** 2, axis=-1, keepdims=True)
    h = (h - mean) / jnp.sqrt(var + LN_EPS) * gamma + beta
    logits = jnp.maximum(h @ w2 + b2, 0.0)
    return jax.nn.softmax(logits, axis=-1)


if __name__ == "__main__":
    num_inputs, num_hiddens = 32, 64
    key = jax.random.PRNGKey(0)
    kx, kp, kx2 = jax.random.split(key, 3)
    params = init_params(kp, num_inputs, num_hiddens)
    prepared_f32 = prepare_params(params)                         # hoisted param prep

    # --- Small primary check (single full block), strict vs pure-JAX reference.
    B = 8
    x = jax.random.normal(kx, (B, num_inputs), jnp.float32)
    ref = reference_forward(x, params)
    out = jax.block_until_ready(classmlp_forward(x, prepared_f32))
    assert out.shape == (B, 2)
    assert jnp.allclose(out, ref, atol=1e-5, rtol=1e-5), "f32 path mismatch vs reference"
    assert jnp.allclose(jnp.sum(out, axis=-1), 1.0, atol=1e-5), "softmax rows must sum to 1"

    # --- Larger batch: multi-step pipelined grid with a ragged last block (no padding).
    B2 = 1000
    x2 = jax.random.normal(kx2, (B2, num_inputs), jnp.float32)
    ref2 = reference_forward(x2, params)
    out2 = jax.block_until_ready(classmlp_forward(x2, prepared_f32, tile_b=256))
    assert out2.shape == (B2, 2)
    assert jnp.allclose(out2, ref2, atol=1e-5, rtol=1e-5), "tiled f32 path mismatch"

    # --- bf16 MXU-input path (weights pre-cast once; x cast inside the kernel).
    prepared_bf16 = prepare_params(params, mxu_dtype=jnp.bfloat16)
    out_bf = jax.block_until_ready(classmlp_forward(x2, prepared_bf16))
    assert out_bf.shape == (B2, 2)
    assert jnp.allclose(out_bf, ref2, atol=5e-2), "bf16 path deviates too far from reference"
    assert jnp.allclose(jnp.sum(out_bf, axis=-1), 1.0, atol=1e-5), "softmax rows must sum to 1"

    print("KERNEL_OK")
</pallas_src>

<mosaic_0001>
module attributes {stable_mosaic.version = 11 : i64} {
  func.func @classmlp_kernel(%arg0: i32, %arg1: memref<8x32xf32, #tpu.memory_space<vmem>>, %arg2: memref<32x64xf32, #tpu.memory_space<vmem>>, %arg3: memref<1x64xf32, #tpu.memory_space<vmem>>, %arg4: memref<1x64xf32, #tpu.memory_space<vmem>>, %arg5: memref<1x64xf32, #tpu.memory_space<vmem>>, %arg6: memref<64x2xf32, #tpu.memory_space<vmem>>, %arg7: memref<1x2xf32, #tpu.memory_space<vmem>>, %arg8: memref<8x2xf32, #tpu.memory_space<vmem>>) attributes {dimension_semantics = [#tpu.dimension_semantics<parallel>], iteration_bounds = array<i64: 1>, scalar_prefetch = 0 : i64, scratch_operands = 0 : i64, tpu.core_type = #tpu.core_type<tc>, window_params = [{transform_indices = @transform_0, window_bounds = array<i64: 8, 32>}, {pipeline_mode = #tpu.pipeline_mode<synchronous>, transform_indices = @transform_1, window_bounds = array<i64: 32, 64>}, {pipeline_mode = #tpu.pipeline_mode<synchronous>, transform_indices = @transform_2, window_bounds = array<i64: 1, 64>}, {pipeline_mode = #tpu.pipeline_mode<synchronous>, transform_indices = @transform_3, window_bounds = array<i64: 1, 64>}, {pipeline_mode = #tpu.pipeline_mode<synchronous>, transform_indices = @transform_4, window_bounds = array<i64: 1, 64>}, {pipeline_mode = #tpu.pipeline_mode<synchronous>, transform_indices = @transform_5, window_bounds = array<i64: 64, 2>}, {pipeline_mode = #tpu.pipeline_mode<synchronous>, transform_indices = @transform_6, window_bounds = array<i64: 1, 2>}, {transform_indices = @transform_7, window_bounds = array<i64: 8, 2>}]} {
    %c0 = arith.constant 0 : index
    %c0_0 = arith.constant 0 : index
    %0 = vector.load %arg1[%c0, %c0_0] : memref<8x32xf32, #tpu.memory_space<vmem>>, vector<8x32xf32>
    %c0_1 = arith.constant 0 : index
    %c0_2 = arith.constant 0 : index
    %1 = vector.load %arg2[%c0_1, %c0_2] : memref<32x64xf32, #tpu.memory_space<vmem>>, vector<32x64xf32>
    %cst = arith.constant dense<0.000000e+00> : vector<8x64xf32>
    %2 = tpu.matmul %0, %1, %cst {dimension_numbers = #tpu.dot_dimension_numbers<[1], [0], [0], [1], [0, 0, 1, 1], [], []>} : vector<8x32xf32>, vector<32x64xf32>, vector<8x64xf32> -> vector<8x64xf32>
    %c0_3 = arith.constant 0 : index
    %c0_4 = arith.constant 0 : index
    %3 = vector.load %arg3[%c0_3, %c0_4] : memref<1x64xf32, #tpu.memory_space<vmem>>, vector<1x64xf32>
    %4 = vector.broadcast %3 : vector<1x64xf32> to vector<8x64xf32>
    %5 = arith.addf %2, %4 : vector<8x64xf32>
    %cst_5 = arith.constant 0.000000e+00 : f32
    %6 = vector.broadcast %cst_5 : f32 to vector<8x64xf32>
    %7 = arith.maximumf %5, %6 : vector<8x64xf32>
    %cst_6 = arith.constant dense<0.000000e+00> : vector<8xf32>
    %8 = vector.multi_reduction <add>, %7, %cst_6 [1] : vector<8x64xf32> to vector<8xf32>
    %9 = vector.shape_cast %8 : vector<8xf32> to vector<8x1xf32>
    %cst_7 = arith.constant 1.562500e-02 : f32
    %10 = vector.broadcast %cst_7 : f32 to vector<8x1xf32>
    %11 = arith.mulf %9, %10 : vector<8x1xf32>
    %12 = vector.broadcast %11 : vector<8x1xf32> to vector<8x64xf32>
    %13 = arith.subf %7, %12 : vector<8x64xf32>
    %14 = arith.mulf %13, %13 : vector<8x64xf32>
    %cst_8 = arith.constant dense<0.000000e+00> : vector<8xf32>
    %15 = vector.multi_reduction <add>, %14, %cst_8 [1] : vector<8x64xf32> to vector<8xf32>
    %16 = vector.shape_cast %15 : vector<8xf32> to vector<8x1xf32>
    %cst_9 = arith.constant 1.562500e-02 : f32
    %17 = vector.broadcast %cst_9 : f32 to vector<8x1xf32>
    %18 = arith.mulf %16, %17 : vector<8x1xf32>
    %cst_10 = arith.constant 9.99999974E-6 : f32
    %19 = vector.broadcast %cst_10 : f32 to vector<8x1xf32>
    %20 = arith.addf %18, %19 : vector<8x1xf32>
    %21 = math.rsqrt %20 : vector<8x1xf32>
    %c0_11 = arith.constant 0 : index
    %c0_12 = arith.constant 0 : index
    %22 = vector.load %arg4[%c0_11, %c0_12] : memref<1x64xf32, #tpu.memory_space<vmem>>, vector<1x64xf32>
    %23 = vector.broadcast %21 : vector<8x1xf32> to vector<8x64xf32>
    %24 = vector.broadcast %22 : vector<1x64xf32> to vector<8x64xf32>
    %25 = arith.mulf %23, %24 : vector<8x64xf32>
    %26 = arith.mulf %13, %25 : vector<8x64xf32>
    %c0_13 = arith.constant 0 : index
    %c0_14 = arith.constant 0 : index
    %27 = vector.load %arg5[%c0_13, %c0_14] : memref<1x64xf32, #tpu.memory_space<vmem>>, vector<1x64xf32>
    %28 = vector.broadcast %27 : vector<1x64xf32> to vector<8x64xf32>
    %29 = arith.addf %26, %28 : vector<8x64xf32>
    %c0_15 = arith.constant 0 : index
    %c0_16 = arith.constant 0 : index
    %30 = vector.load %arg6[%c0_15, %c0_16] : memref<64x2xf32, #tpu.memory_space<vmem>>, vector<64x2xf32>
    %cst_17 = arith.constant dense<0.000000e+00> : vector<8x2xf32>
    %31 = tpu.matmul %29, %30, %cst_17 {dimension_numbers = #tpu.dot_dimension_numbers<[1], [0], [0], [1], [0, 0, 1, 1], [], []>} : vector<8x64xf32>, vector<64x2xf32>, vector<8x2xf32> -> vector<8x2xf32>
    %c0_18 = arith.constant 0 : index
    %c0_19 = arith.constant 0 : index
    %32 = vector.load %arg7[%c0_18, %c0_19] : memref<1x2xf32, #tpu.memory_space<vmem>>, vector<1x2xf32>
    %33 = vector.broadcast %32 : vector<1x2xf32> to vector<8x2xf32>
    %34 = arith.addf %31, %33 : vector<8x2xf32>
    %cst_20 = arith.constant 0.000000e+00 : f32
    %35 = vector.broadcast %cst_20 : f32 to vector<8x2xf32>
    %36 = arith.maximumf %34, %35 : vector<8x2xf32>
    %37 = vector.extract_strided_slice %36 {offsets = [0, 0], sizes = [8, 1], strides = [1, 1]} : vector<8x2xf32> to vector<8x1xf32>
    %38 = vector.extract_strided_slice %36 {offsets = [0, 1], sizes = [8, 1], strides = [1, 1]} : vector<8x2xf32> to vector<8x1xf32>
    %39 = arith.subf %37, %38 : vector<8x1xf32>
    %40 = math.exp %39 : vector<8x1xf32>
    %cst_21 = arith.constant 1.000000e+00 : f32
    %41 = vector.broadcast %cst_21 : f32 to vector<8x1xf32>
    %42 = arith.addf %41, %40 : vector<8x1xf32>
    %cst_22 = arith.constant 1.000000e+00 : f32
    %43 = vector.broadcast %cst_22 : f32 to vector<8x1xf32>
    %44 = arith.divf %43, %42 : vector<8x1xf32>
    %cst_23 = arith.constant 1.000000e+00 : f32
    %45 = vector.broadcast %cst_23 : f32 to vector<8x1xf32>
    %46 = arith.subf %45, %44 : vector<8x1xf32>
    %47 = tpu.iota {dimensions = array<i32: 1>} : vector<8x2xi32>
    %c0_i32 = arith.constant 0 : i32
    %48 = vector.broadcast %c0_i32 : i32 to vector<8x2xi32>
    %49 = arith.cmpi eq, %47, %48 : vector<8x2xi32>
    %50 = vector.shape_cast %46 : vector<8x1xf32> to vector<8x1xf32>
    %51 = vector.broadcast %50 : vector<8x1xf32> to vector<8x2xf32>
    %52 = vector.shape_cast %44 : vector<8x1xf32> to vector<8x1xf32>
    %53 = vector.broadcast %52 : vector<8x1xf32> to vector<8x2xf32>
    %54 = arith.select %49, %51, %53 : vector<8x2xi1>, vector<8x2xf32>
    %c0_24 = arith.constant 0 : index
    %c0_25 = arith.constant 0 : index
    %55 = vector.load %arg8[%c0_24, %c0_25] : memref<8x2xf32, #tpu.memory_space<vmem>>, vector<8x2xf32>
    tpu.vector_store %arg8[%c0_24, %c0_25], %54 {strides = array<i32>} : memref<8x2xf32, #tpu.memory_space<vmem>>, vector<8x2xf32>,
    return
  }
  func.func @transform_0(%arg0: i32) -> (i32, i32) {
    %c0_i32 = arith.constant 0 : i32
    %c0_i32_0 = arith.constant 0 : i32
    return %arg0, %c0_i32 : i32, i32
  }
  func.func @transform_1(%arg0: i32) -> (i32, i32) {
    %c0_i32 = arith.constant 0 : i32
    %c0_i32_0 = arith.constant 0 : i32
    %c0_i32_1 = arith.constant 0 : i32
    return %c0_i32, %c0_i32_0 : i32, i32
  }
  func.func @transform_2(%arg0: i32) -> (i32, i32) {
    %c0_i32 = arith.constant 0 : i32
    %c0_i32_0 = arith.constant 0 : i32
    %c0_i32_1 = arith.constant 0 : i32
    return %c0_i32, %c0_i32_0 : i32, i32
  }
  func.func @transform_3(%arg0: i32) -> (i32, i32) {
    %c0_i32 = arith.constant 0 : i32
    %c0_i32_0 = arith.constant 0 : i32
    %c0_i32_1 = arith.constant 0 : i32
    return %c0_i32, %c0_i32_0 : i32, i32
  }
  func.func @transform_4(%arg0: i32) -> (i32, i32) {
    %c0_i32 = arith.constant 0 : i32
    %c0_i32_0 = arith.constant 0 : i32
    %c0_i32_1 = arith.constant 0 : i32
    return %c0_i32, %c0_i32_0 : i32, i32
  }
  func.func @transform_5(%arg0: i32) -> (i32, i32) {
    %c0_i32 = arith.constant 0 : i32
    %c0_i32_0 = arith.constant 0 : i32
    %c0_i32_1 = arith.constant 0 : i32
    return %c0_i32, %c0_i32_0 : i32, i32
  }
  func.func @transform_6(%arg0: i32) -> (i32, i32) {
    %c0_i32 = arith.constant 0 : i32
    %c0_i32_0 = arith.constant 0 : i32
    %c0_i32_1 = arith.constant 0 : i32
    return %c0_i32, %c0_i32_0 : i32, i32
  }
  func.func @transform_7(%arg0: i32) -> (i32, i32) {
    %c0_i32 = arith.constant 0 : i32
    %c0_i32_0 = arith.constant 0 : i32
    return %arg0, %c0_i32 : i32, i32
  }
}

</mosaic_0001>

<bundles_post_ra>
// kernel: tpu_custom_call.1
= control target key start
LH: loop header
LB: loop body
LE: loop exit
PB: predicated region body
PF: predicated region fallthrough
CT: control target
= control target key end

     0   :  { %vm35_vm0 = vcmask 261120   ;;  %vm60_vm1 = vcmask 523264   ;;  %v191_v42 = vmov 0   ;;  %v153_v59 = vlaneseq  ;;  %s289_s1 = inlined_call_operand.vmem [shape: f32[32,64], index: 1, kind: input, shape index: {}]   ;;  %s290_s2 = inlined_call_operand.vmem [shape: f32[1,64], index: 2, kind: input, shape index: {}]   ;;  %s291_s0 = inlined_call_operand.vmem [shape: f32[8,32], index: 0, kind: input, shape index: {}]   ;;  %s292_s3 = inlined_call_operand.vmem [shape: f32[1,64], index: 3, kind: input, shape index: {}]   ;;  %s293_s4 = inlined_call_operand.vmem [shape: f32[1,64], index: 4, kind: input, shape index: {}]   ;;  %s294_s6 = inlined_call_operand.vmem [shape: f32[1,2], index: 6, kind: input, shape index: {}]   ;;  %s295_s5 = inlined_call_operand.vmem [shape: f32[64,2], index: 5, kind: input, shape index: {}]   ;;  %s296_s7 = inlined_call_operand.vmem [shape: f32[8,2], index: 7, kind: output, shape index: {}]  }
   0x1   :  { %v30_v0 = vld [vmem:[%s289_s1 + $0x18] sm:$0xff]  ;;  %v29_v1 = vld [vmem:[%s289_s1 + $0x10] sm:$0xff]  ;;  %v28_v2 = vld [vmem:[%s289_s1 + $0x8] sm:$0xff]  ;;  %178 = vset.pattern.permute.xlu2 %v191_v42  ;;  %177 = vset.pattern.permute.xlu1 %v191_v42  ;;  %vm167_vm10 = vcmask 15360  }
   0x2   :  { %51 = vmatpush.msra.mxu0 %v30_v0  ;;  %v27_v3 = vld [vmem:[%s289_s1] sm:$0xff]  ;;  %v100_v15 = vld [vmem:[%s295_s5 + $0x38] sm:$0xff]  ;;  %v99_v16 = vld [vmem:[%s295_s5 + $0x30] sm:$0xff]  ;;  %179 = vset.pattern.permute.xlu0 %v191_v42  ;;  %v154_v60 = vand.u32 127, %v153_v59 }
   0x3   :  { %v26_v4 = vld [vmem:[%s291_s0] sm:$0xff]  ;;  %116 = vmatpush.msra.mxu1 %v100_v15  ;;  %v98_v17 = vld [vmem:[%s295_s5 + $0x28] sm:$0xff]  ;;  %v96_v19 = vld [vmem:[%s295_s5 + $0x18] sm:$0xff] }
   0x4   :  { %52 = vmatpush.msra.mxu0 %v29_v1  ;;  %v180_v5 = vld [vmem:[%s290_s2] ss:$0 sm:$0xff]  ;;  %v95_v20 = vld [vmem:[%s295_s5 + $0x10] sm:$0xff]  ;;  %v94_v21 = vld [vmem:[%s295_s5 + $0x8] sm:$0xff]  ;;  %vm155_vm9 = vcmp.eq.s32.totalorder %v154_v60, 0 }
   0x5   :  { %117 = vmatpush.msra.mxu1 %v99_v16  ;;  %v97_v18 = vld [vmem:[%s295_s5 + $0x20] sm:$0xff] }
   0x6   :  { %53 = vmatpush.msra.mxu0 %v28_v2  ;;  %v93_v22 = vld [vmem:[%s295_s5] sm:$0xff] }
   0x7   :  { %118 = vmatpush.msra.mxu1 %v98_v17  ;;  %v181_v31 = vld [vmem:[%s292_s3] ss:$0 sm:$0xff]  ;;  %s190_s3 = smov 127  }
   0x8   :  { %54 = vmatpush.msra.mxu0 %v27_v3  ;;  %v182_v35 = vld [vmem:[%s293_s4] ss:$0 sm:$0xff] }
   0x9   :  { %173 = vmatmul.msk.f32.vlgmr.msra.gmra.mxu0 %vm35_vm0, %v26_v4  ;;  %119 = vmatpush.msra.mxu1 %v97_v18  ;;  %v183_v38 = vld [vmem:[%s294_s6] ss:$0 sm:$0xff] }
   0xb   :  { %120 = vmatpush.msra.mxu1 %v96_v19 }
   0xd   :  { %121 = vmatpush.msra.mxu1 %v95_v20 }
   0xf   :  { %122 = vmatpush.msra.mxu1 %v94_v21 }
  0x11   :  { %123 = vmatpush.msra.mxu1 %v93_v22 }
  0x86   :  { %v56_v6 = vpop.f32.mrf.mxu0 }
  0x87   :  { %v57_v7 = vadd.f32 %v180_v5, %v56_v6 }
  0x89   :  { %v59_v8 = vmax.f32 %v57_v7, 0.0 }
  0x8b   :  { %v61_v9 = vsel %vm60_vm1, %v59_v8, 0.0 }
  0x8c   :  { %62 = vadd.xlane.f32.xlu0 %v61_v9 }
  0xff   :  { %v63_v10 = vpop.xlane.xlu0 %62 }
 0x100   :  { %v64_v11 = vmul.f32 0.015625, %v63_v10 }
 0x102   :  { %v65_v12 = vsub.f32 %v59_v8, %v64_v11 }
 0x104   :  { %v66_v13 = vmul.f32 %v65_v12, %v65_v12 }
 0x106   :  { %v67_v14 = vsel %vm60_vm1, %v66_v13, 0.0 }
 0x107   :  { %68 = vadd.xlane.f32.xlu0 %v67_v14 }
 0x17a   :  { %v69_v23 = vpop.xlane.xlu0 %68 }
 0x17b   :  { %v70_v24 = vmul.f32 0.015625, %v69_v23 }
 0x17d   :  { %v71_v25 = vadd.f32 1e-05, %v70_v24 }
 0x17f   :  { %184 = vrsqrt.f32 %v71_v25  ;;  %vm78_vm3 = vweird.f32 %v71_v25 }
 0x185   :  { %v185_v26 = vpop.eup %184 }
 0x186   :  { %v73_v27 = vmul.f32 %v185_v26, %v71_v25  ;;  %vm79_vm2 = vweird.f32 %v185_v26 }
 0x187   :  { %vm80_vm4 = vmor %vm78_vm3, %vm79_vm2 }
 0x188   :  { %v74_v28 = vmul.f32 %v185_v26, %v73_v27 }
 0x18a   :  { %v75_v29 = vmul.f32 0.5, %v74_v28 }
 0x18c   :  { %v76_v30 = vsub.f32 1.5, %v75_v29 }
 0x18e   :  { %v77_v32 = vmul.f32 %v185_v26, %v76_v30 }
 0x190   :  { %v81_v33 = vsel %vm80_vm4, %v185_v26, %v77_v32 }
 0x191   :  { %v86_v34 = vmul.f32 %v181_v31, %v81_v33 }
 0x193   :  { %v87_v36 = vmul.f32 %v86_v34, %v65_v12 }
 0x195   :  { %v92_v37 = vadd.f32 %v182_v35, %v87_v36 }
 0x197   :  { %174 = vmatmul.msk.f32.vlgmr.msra.gmra.mxu1 %vm60_vm1, %v92_v37 }
 0x214   :  { %v125_v39 = vpop.f32.mrf.mxu1 }
 0x215   :  { %v126_v40 = vadd.f32 %v183_v38, %v125_v39 }
 0x217   :  { %v128_v41 = vmax.f32 %v126_v40, 0.0 }
 0x219   :  { %130 = vrot.lane.b32.xlu1 %v128_v41, %s190_s3 }
 0x28b   :  { %v131_v43 = vpop.permute.xlu1 %130 }
 0x28c   :  { %v133_v44 = vsub.f32 %v128_v41, %v131_v43 }
 0x28e   :  { %v134_v45 = vmul.f32 1.442695, %v133_v44 }
 0x290   :  { %186 = vpow2.f32 %v134_v45 }
 0x296   :  { %v187_v46 = vpop.eup %186 }
 0x297   :  { %v136_v47 = vadd.f32 1.0, %v187_v46 }
 0x299   :  { %188 = vrcp.f32 %v136_v47  ;;  %v148_v51 = vand.u32 2147483648, %v136_v47  ;;  %v146_v53 = vand.u32 2147483647, %v136_v47  ;;  %vm142_vm6 = vweird.f32 %v136_v47 }
 0x29b   :  { %v149_v55 = vor.u32 1.1754944e-38, %v148_v51  ;;  %vm147_vm8 = vcmp.eq.f32.partialorder %v146_v53, 8.507059e+37 }
 0x29f   :  { %v189_v48 = vpop.eup %188 }
 0x2a0   :  { %v138_v49 = vmul.f32 %v189_v48, %v136_v47  ;;  %vm143_vm5 = vweird.f32 %v189_v48 }
 0x2a1   :  { %vm144_vm7 = vmor %vm142_vm6, %vm143_vm5 }
 0x2a2   :  { %v139_v50 = vsub.f32 1.0, %v138_v49 }
 0x2a4   :  { %v140_v52 = vmul.f32 %v189_v48, %v139_v50 }
 0x2a6   :  { %v141_v54 = vadd.f32 %v189_v48, %v140_v52 }
 0x2a8   :  { %v145_v56 = vsel %vm144_vm7, %v189_v48, %v141_v54 }
 0x2a9   :  { %v150_v57 = vsel %vm147_vm8, %v149_v55, %v145_v56 }
 0x2aa   :  { %163 = vperm.xlu2 %178, %v150_v57   ;;  %v152_v58 = vsub.f32 1.0, %v150_v57 }
 0x2ac   :  { %158 = vperm.xlu1 %177, %v152_v58  }
 0x304   :  { %v164_v61 = vpop.permute.xlu2 %163 }
 0x31e   :  { %v159_v62 = vpop.permute.xlu1 %158 }
 0x31f   :  { %v166_v63 = vsel %vm155_vm9, %v159_v62, %v164_v61 }
 0x320   :  { %168 = vst.msk [vmem:[%s296_s7] sm:$0xff] %vm167_vm10, %v166_v63 }

</bundles_post_ra>
